<compile_context>
chip_gen: v5e
topology: v5e:2x2
jax: 0.10.0
libtpu: 0.0.40
codegen_flags: <defaults>
</compile_context>

<pallas_src>
import functools

import jax
import jax.numpy as jnp
from jax.experimental import pallas as pl
from jax.experimental.pallas import tpu as pltpu


def _round_up(x, m):
    return (x + m - 1) // m * m


def _lane(c):
    return _round_up(c, 128)


def _sub(r):
    return _round_up(r, 8)


# --------------------------------------------------------------------------- kernels
def _conv3x3_gemm_kernel(x_ref, w_ref, b_ref, out_ref, *, CoutP, CoutStore):
    # Small-Cin path: wrapper already built im2col rows.
    # x_ref  : (TP, 9*Cin)   w_ref: (9*Cin, CoutP)   b_ref: (1, CoutP) f32
    # out_ref: (TP, CoutStore)
    acc = jnp.dot(x_ref[...], w_ref[...], preferred_element_type=jnp.float32)
    acc = acc + b_ref[...].astype(jnp.float32)
    if CoutStore < CoutP:
        acc = acc[:, :CoutStore]
    out_ref[...] = acc.astype(out_ref.dtype)


def _conv3x3_taps_kernel(x_ref, w_ref, b_ref, out_ref, *, TH, W, Cin, CoutP, CoutStore):
    # Large-Cin path: 9 accumulated per-tap MXU dots, no im2col slab.
    # x_ref  : (TH+2, W+2, Cin) halo'd rows   w_ref: (9, Cin, CoutP)
    # b_ref  : (1, CoutP) f32                 out_ref: (TH*W, CoutStore)
    acc = jnp.zeros((TH * W, CoutP), jnp.float32)
    for t in range(9):
        kh, kw = divmod(t, 3)
        xt = x_ref[pl.ds(kh, TH), pl.ds(kw, W), :].reshape(TH * W, Cin)
        acc = acc + jnp.dot(xt, w_ref[t], preferred_element_type=jnp.float32)
    acc = acc + b_ref[...].astype(jnp.float32)
    if CoutStore < CoutP:
        acc = acc[:, :CoutStore]
    out_ref[...] = acc.astype(out_ref.dtype)


# --------------------------------------------------------------------------- helpers
def _pad_index(padded_len, orig_len, use_refl):
    """Padded coordinate -> source coordinate for pad=1, plus validity mask."""
    q = jnp.arange(padded_len) - 1
    if use_refl:
        q = jnp.where(q < 0, -q, q)
        q = jnp.where(q > orig_len - 1, 2 * (orig_len - 1) - q, q)
        valid = jnp.ones((padded_len,), dtype=jnp.bool_)
    else:
        valid = (q >= 0) & (q <= orig_len - 1)
        q = jnp.clip(q, 0, orig_len - 1)
    return q, valid


def _vmem_capacity_bytes():
    try:
        cap = getattr(pltpu.get_tpu_info(), "vmem_capacity_bytes", None)
        if cap:
            return int(cap)
    except Exception:
        pass
    return 64 << 20  # conservative (v7x per-TensorCore)


def _gemm_block_bytes(tp, K, CoutP, CoutStore, in_isz, out_isz):
    in_blk = _sub(tp) * _lane(K) * in_isz
    out_blk = _sub(tp) * _lane(CoutStore) * out_isz
    w_blk = _sub(K) * _lane(CoutP) * in_isz
    b_blk = 8 * _lane(CoutP) * 4
    acc = _sub(tp) * _lane(CoutP) * 4            # f32 accumulator temp
    return 2 * (in_blk + out_blk + w_blk + b_blk) + acc


def _taps_block_bytes(th, W, Cin, CoutP, CoutStore, in_isz, out_isz):
    in_blk = (th + 2) * _sub(W + 2) * _lane(Cin) * in_isz
    out_blk = _sub(th * W) * _lane(CoutStore) * out_isz
    w_blk = 9 * _sub(Cin) * _lane(CoutP) * in_isz
    b_blk = 8 * _lane(CoutP) * 4
    acc = _sub(th * W) * _lane(CoutP) * 4        # f32 accumulator temp
    tap = _sub(th * W) * _lane(Cin) * in_isz     # per-tap operand temp
    return 2 * (in_blk + out_blk + w_blk + b_blk) + acc + 2 * tap


def _pick_tile_pixels(P, K, CoutP, CoutStore, in_isz, out_isz, budget):
    cands = [d for d in range(P, 0, -1) if P % d == 0 and d % 8 == 0] or [P]
    for tp in cands:
        if _gemm_block_bytes(tp, K, CoutP, CoutStore, in_isz, out_isz) <= budget:
            return tp
    return cands[-1]


def _pick_tile_rows(H, W, Cin, CoutP, CoutStore, in_isz, out_isz, budget):
    cands = [d for d in range(H, 0, -1)
             if H % d == 0 and ((d * W) % 8 == 0 or d == H)] or [H]
    for th in cands:
        if _taps_block_bytes(th, W, Cin, CoutP, CoutStore, in_isz, out_isz) <= budget:
            return th
    return cands[-1]


# --------------------------------------------------------------------------- paths
def _conv_small_cin(x_nchw, weight_oihw, bias, use_refl, cdt, out_dtype,
                    CoutP, CoutStore, tile_pixels, budget, vmem_limit):
    """Cin < 128: wrapper-side im2col, single lane-dense GEMM per tile."""
    N, Cin, H, W = x_nchw.shape
    Cout = weight_oihw.shape[0]
    K = 9 * Cin
    P = H * W

    # Fused pad + im2col gather (one XLA gather chain) in the original dtype.
    row_q, row_valid = _pad_index(H + 2, H, use_refl)
    col_q, col_valid = _pad_index(W + 2, W, use_refl)
    rh = jnp.arange(H)[:, None] + jnp.arange(3)[None, :]        # (H, 3)
    rw = jnp.arange(W)[:, None] + jnp.arange(3)[None, :]        # (W, 3)
    rows, rvalid = row_q[rh], row_valid[rh]
    cols, cvalid = col_q[rw], col_valid[rw]

    xg = x_nchw[:, :, rows, :]                                  # (N, Cin, H, 3, W)
    xg = xg[..., cols]                                          # (N, Cin, H, 3, W, 3)
    if not use_refl:                                            # zero-pad: mask border
        xg = xg * rvalid.astype(xg.dtype)[None, None, :, :, None, None]
        xg = xg * cvalid.astype(xg.dtype)[None, None, None, None, :, :]
    # (N, H, W, kh, kw, Cin) -> (N, H*W, 9*Cin); lane axis is 9*Cin (im2col rows)
    xcol = jnp.transpose(xg, (0, 2, 4, 3, 5, 1)).reshape(N, P, K).astype(cdt)

    # weights: (Cout, Cin, 3, 3) -> (9*Cin, CoutP), taps on the contraction axis
    w_flat = jnp.transpose(weight_oihw, (2, 3, 1, 0)).reshape(K, Cout)
    w_flat = jnp.pad(w_flat, ((0, 0), (0, CoutP - Cout))).astype(cdt)
    b_pad = jnp.pad(bias.astype(jnp.float32), (0, CoutP - Cout)).reshape(1, CoutP)

    out_isz = jnp.dtype(out_dtype).itemsize
    TP = tile_pixels or _pick_tile_pixels(P, K, CoutP, CoutStore,
                                          cdt.itemsize, out_isz, budget)
    assert P % TP == 0 and (TP % 8 == 0 or TP == P), "bad tile_pixels"
    num_tiles = P // TP

    kernel = functools.partial(_conv3x3_gemm_kernel, CoutP=CoutP, CoutStore=CoutStore)
    return pl.pallas_call(
        kernel,
        out_shape=jax.ShapeDtypeStruct((N, P, CoutStore), out_dtype),
        grid_spec=pltpu.PrefetchScalarGridSpec(
            num_scalar_prefetch=0,
            grid=(N, num_tiles),
            in_specs=[
                pl.BlockSpec((None, TP, K), lambda n, i: (n, i, 0)),
                pl.BlockSpec((K, CoutP), lambda n, i: (0, 0)),
                pl.BlockSpec((1, CoutP), lambda n, i: (0, 0)),
            ],
            out_specs=pl.BlockSpec((None, TP, CoutStore), lambda n, i: (n, i, 0)),
        ),
        compiler_params=pltpu.CompilerParams(
            dimension_semantics=("parallel", "parallel"),
            vmem_limit_bytes=vmem_limit,
        ),
    )(xcol, w_flat, b_pad)


def _conv_large_cin(x_nchw, weight_oihw, bias, use_refl, cdt, out_dtype,
                    CoutP, CoutStore, tile_rows, budget, vmem_limit):
    """Cin >= 128: halo'd row tiles, 9 accumulated per-tap MXU dots (no im2col slab)."""
    N, Cin, H, W = x_nchw.shape
    Cout = weight_oihw.shape[0]
    out_isz = jnp.dtype(out_dtype).itemsize

    TH = tile_rows or _pick_tile_rows(H, W, Cin, CoutP, CoutStore,
                                      cdt.itemsize, out_isz, budget)
    assert H % TH == 0, "tile_rows must divide H"
    num_tiles = H // TH

    # Fused pad + halo-row gather + NCHW->NHWC (one XLA gather chain).
    # TODO(synk): replace this HBM halo pre-expansion with overlapping-window
    # BlockSpecs (pl.Element) or manual make_async_copy to avoid the extra pass.
    row_q, row_valid = _pad_index(H + 2, H, use_refl)
    col_q, col_valid = _pad_index(W + 2, W, use_refl)
    win = (jnp.arange(num_tiles) * TH)[:, None] + jnp.arange(TH + 2)[None, :]
    tile_rows_idx = row_q[win]                                  # (T, TH+2)

    xg = x_nchw[:, :, tile_rows_idx, :]                         # (N, Cin, T, TH+2, W)
    xg = xg[..., col_q]                                         # (N, Cin, T, TH+2, W+2)
    if not use_refl:
        rv = row_valid[win].astype(xg.dtype)
        cv = col_valid.astype(xg.dtype)
        xg = xg * rv[None, None, :, :, None] * cv[None, None, None, None, :]
    x_tiles = jnp.transpose(xg, (0, 2, 3, 4, 1)).astype(cdt)    # (N, T, TH+2, W+2, Cin)

    # weights: (Cout, Cin, 3, 3) -> (9, Cin, CoutP)
    w_taps = jnp.transpose(weight_oihw, (2, 3, 1, 0)).reshape(9, Cin, Cout)
    w_taps = jnp.pad(w_taps, ((0, 0), (0, 0), (0, CoutP - Cout))).astype(cdt)
    b_pad = jnp.pad(bias.astype(jnp.float32), (0, CoutP - Cout)).reshape(1, CoutP)

    kernel = functools.partial(_conv3x3_taps_kernel, TH=TH, W=W, Cin=Cin,
                               CoutP=CoutP, CoutStore=CoutStore)
    return pl.pallas_call(
        kernel,
        out_shape=jax.ShapeDtypeStruct((N, H * W, CoutStore), out_dtype),
        grid_spec=pltpu.PrefetchScalarGridSpec(
            num_scalar_prefetch=0,
            grid=(N, num_tiles),
            in_specs=[
                pl.BlockSpec((None, None, TH + 2, W + 2, Cin),
                             lambda n, i: (n, i, 0, 0, 0)),
                pl.BlockSpec((9, Cin, CoutP), lambda n, i: (0, 0, 0)),
                pl.BlockSpec((1, CoutP), lambda n, i: (0, 0)),
            ],
            out_specs=pl.BlockSpec((None, TH * W, CoutStore), lambda n, i: (n, i, 0)),
        ),
        compiler_params=pltpu.CompilerParams(
            dimension_semantics=("parallel", "parallel"),
            vmem_limit_bytes=vmem_limit,
        ),
    )(x_tiles, w_taps, b_pad)


# --------------------------------------------------------------------------- public
def conv3x3_pallas(x_nchw, weight_oihw, bias, *, use_refl=True,
                   compute_dtype=None, tile_pixels=None, tile_rows=None,
                   nchw_out=True):
    """ReflectionPad2d(1)/ZeroPad2d(1) + Conv2d(Cin, Cout, 3) forward.

    x_nchw: (N, Cin, H, W); weight_oihw: (Cout, Cin, 3, 3); bias: (Cout,).
    compute_dtype=jnp.bfloat16 feeds bf16 MXU operands (f32 accumulation).
    nchw_out=False returns NHWC and skips the final transpose HBM pass.
    """
    N, Cin, H, W = x_nchw.shape
    Cout = weight_oihw.shape[0]
    out_dtype = x_nchw.dtype
    cdt = jnp.dtype(compute_dtype) if compute_dtype is not None else jnp.dtype(out_dtype)

    CoutP = _round_up(Cout, 128)                    # MXU N dimension (lane-padded)
    # Small Cout: store exactly Cout channels (masked vst, but no 16x HBM write
    # amplification).  Large Cout: lane-dense padded store, sliced in the wrapper.
    CoutStore = Cout if Cout < 128 else _round_up(Cout, 128)

    # Per-generation VMEM budget: v5e/v6e (128 MiB) -> 96 MiB cap; v7x (64 MiB) -> 48 MiB.
    cap = _vmem_capacity_bytes()
    vmem_limit = int(min(96 << 20, cap * 3 // 4))
    budget = max(16 << 20, vmem_limit - (8 << 20))  # headroom for Mosaic scratch

    if Cin < 128:
        out_flat = _conv_small_cin(x_nchw, weight_oihw, bias, use_refl, cdt, out_dtype,
                                   CoutP, CoutStore, tile_pixels, budget, vmem_limit)
    else:
        out_flat = _conv_large_cin(x_nchw, weight_oihw, bias, use_refl, cdt, out_dtype,
                                   CoutP, CoutStore, tile_rows, budget, vmem_limit)

    out = out_flat.reshape(N, H, W, CoutStore)
    if CoutStore != Cout:
        out = out[..., :Cout]
    if nchw_out:
        out = jnp.transpose(out, (0, 3, 1, 2))      # NHWC -> NCHW (module semantics)
    return out


def conv3x3_reference(x_nchw, weight_oihw, bias, *, use_refl=True):
    pad_mode = "reflect" if use_refl else "constant"
    x_pad = jnp.pad(x_nchw, ((0, 0), (0, 0), (1, 1), (1, 1)), mode=pad_mode)
    out = jax.lax.conv_general_dilated(
        x_pad, weight_oihw, window_strides=(1, 1), padding="VALID",
        dimension_numbers=("NCHW", "OIHW", "NCHW"))
    return out + bias.reshape(1, -1, 1, 1)


if __name__ == "__main__":
    key = jax.random.PRNGKey(0)
    kx, kw, kb = jax.random.split(key, 3)

    # --- small-Cin / small-Cout path (wrapper-side im2col, exact-Cout stores) ------
    N, Cin, Cout, H, W = 2, 4, 8, 16, 16
    x = jax.random.normal(kx, (N, Cin, H, W), dtype=jnp.float32)
    weight = jax.random.normal(kw, (Cout, Cin, 3, 3), dtype=jnp.float32) * 0.1
    bias = jax.random.normal(kb, (Cout,), dtype=jnp.float32) * 0.1

    # Reflection pad, forced 2-tile-per-image grid to exercise multi-step pipelining.
    out_refl = jax.block_until_ready(
        conv3x3_pallas(x, weight, bias, use_refl=True, tile_pixels=128))
    ref_refl = conv3x3_reference(x, weight, bias, use_refl=True)
    assert out_refl.shape == (N, Cout, H, W)
    assert jnp.allclose(out_refl, ref_refl, atol=1e-4, rtol=1e-4)

    # Zero pad, auto-selected tile.
    out_zero = jax.block_until_ready(
        conv3x3_pallas(x, weight, bias, use_refl=False))
    ref_zero = conv3x3_reference(x, weight, bias, use_refl=False)
    assert jnp.allclose(out_zero, ref_zero, atol=1e-4, rtol=1e-4)

    # bf16 MXU operands (f32 accumulation) -- only operand-rounding error expected.
    out_bf16 = jax.block_until_ready(
        conv3x3_pallas(x, weight, bias, use_refl=True, compute_dtype=jnp.bfloat16))
    assert jnp.allclose(out_bf16, ref_refl, atol=1e-1, rtol=1e-1)

    # --- large-Cin path (per-tap accumulated MXU dots, halo'd row tiles) ------------
    N2, Cin2, Cout2, H2, W2 = 1, 128, 128, 8, 16
    k2x, k2w, k2b = jax.random.split(jax.random.PRNGKey(1), 3)
    x2 = jax.random.normal(k2x, (N2, Cin2, H2, W2), dtype=jnp.float32)
    w2 = jax.random.normal(k2w, (Cout2, Cin2, 3, 3), dtype=jnp.float32) * 0.05
    b2 = jax.random.normal(k2b, (Cout2,), dtype=jnp.float32) * 0.1
    out2 = jax.block_until_ready(conv3x3_pallas(x2, w2, b2, use_refl=True))
    ref2 = conv3x3_reference(x2, w2, b2, use_refl=True)
    assert out2.shape == (N2, Cout2, H2, W2)
    assert jnp.allclose(out2, ref2, atol=3e-2, rtol=3e-2)

    print("KERNEL_OK")
</pallas_src>

<mosaic_0001>
module attributes {stable_mosaic.version = 11 : i64} {
  func.func @_conv3x3_gemm_kernel(%arg0: i32, %arg1: i32, %arg2: memref<1x128x36xf32, #tpu.memory_space<vmem>>, %arg3: memref<36x128xf32, #tpu.memory_space<vmem>>, %arg4: memref<1x128xf32, #tpu.memory_space<vmem>>, %arg5: memref<1x128x8xf32, #tpu.memory_space<vmem>>) attributes {dimension_semantics = [#tpu.dimension_semantics<parallel>, #tpu.dimension_semantics<parallel>], iteration_bounds = array<i64: 2, 2>, scalar_prefetch = 0 : i64, scratch_operands = 0 : i64, tpu.core_type = #tpu.core_type<tc>, window_params = [{transform_indices = @transform_0, window_bounds = array<i64: 1, 128, 36>}, {pipeline_mode = #tpu.pipeline_mode<synchronous>, transform_indices = @transform_1, window_bounds = array<i64: 36, 128>}, {pipeline_mode = #tpu.pipeline_mode<synchronous>, transform_indices = @transform_2, window_bounds = array<i64: 1, 128>}, {transform_indices = @transform_3, window_bounds = array<i64: 1, 128, 8>}]} {
    %c0 = arith.constant 0 : index
    %c0_0 = arith.constant 0 : index
    %c0_1 = arith.constant 0 : index
    %0 = vector.load %arg2[%c0, %c0_0, %c0_1] : memref<1x128x36xf32, #tpu.memory_space<vmem>>, vector<1x128x36xf32>
    %1 = vector.shape_cast %0 : vector<1x128x36xf32> to vector<128x36xf32>
    %c0_2 = arith.constant 0 : index
    %c0_3 = arith.constant 0 : index
    %2 = vector.load %arg3[%c0_2, %c0_3] : memref<36x128xf32, #tpu.memory_space<vmem>>, vector<36x128xf32>
    %cst = arith.constant dense<0.000000e+00> : vector<128x128xf32>
    %3 = tpu.matmul %1, %2, %cst {dimension_numbers = #tpu.dot_dimension_numbers<[1], [0], [0], [1], [0, 0, 1, 1], [], []>} : vector<128x36xf32>, vector<36x128xf32>, vector<128x128xf32> -> vector<128x128xf32>
    %c0_4 = arith.constant 0 : index
    %c0_5 = arith.constant 0 : index
    %4 = vector.load %arg4[%c0_4, %c0_5] : memref<1x128xf32, #tpu.memory_space<vmem>>, vector<1x128xf32>
    %5 = vector.broadcast %4 : vector<1x128xf32> to vector<128x128xf32>
    %6 = arith.addf %3, %5 : vector<128x128xf32>
    %7 = vector.extract_strided_slice %6 {offsets = [0, 0], sizes = [128, 8], strides = [1, 1]} : vector<128x128xf32> to vector<128x8xf32>
    %c0_6 = arith.constant 0 : index
    %c0_7 = arith.constant 0 : index
    %c0_8 = arith.constant 0 : index
    %8 = vector.load %arg5[%c0_6, %c0_7, %c0_8] : memref<1x128x8xf32, #tpu.memory_space<vmem>>, vector<1x128x8xf32>
    %9 = vector.shape_cast %8 : vector<1x128x8xf32> to vector<128x8xf32>
    %10 = vector.shape_cast %7 : vector<128x8xf32> to vector<1x128x8xf32>
    tpu.vector_store %arg5[%c0_6, %c0_7, %c0_8], %10 {strides = array<i32>} : memref<1x128x8xf32, #tpu.memory_space<vmem>>, vector<1x128x8xf32>,
    return
  }
  func.func @transform_0(%arg0: i32, %arg1: i32) -> (i32, i32, i32) {
    %c0_i32 = arith.constant 0 : i32
    %c0_i32_0 = arith.constant 0 : i32
    return %arg0, %arg1, %c0_i32 : i32, i32, i32
  }
  func.func @transform_1(%arg0: i32, %arg1: i32) -> (i32, i32) {
    %c0_i32 = arith.constant 0 : i32
    %c0_i32_0 = arith.constant 0 : i32
    %c0_i32_1 = arith.constant 0 : i32
    return %c0_i32, %c0_i32_0 : i32, i32
  }
  func.func @transform_2(%arg0: i32, %arg1: i32) -> (i32, i32) {
    %c0_i32 = arith.constant 0 : i32
    %c0_i32_0 = arith.constant 0 : i32
    %c0_i32_1 = arith.constant 0 : i32
    return %c0_i32, %c0_i32_0 : i32, i32
  }
  func.func @transform_3(%arg0: i32, %arg1: i32) -> (i32, i32, i32) {
    %c0_i32 = arith.constant 0 : i32
    %c0_i32_0 = arith.constant 0 : i32
    return %arg0, %arg1, %c0_i32 : i32, i32, i32
  }
}

</mosaic_0001>

<bundles_post_ra>
// kernel: tpu_custom_call.1
= control target key start
LH: loop header
LB: loop body
LE: loop exit
PB: predicated region body
PF: predicated region fallthrough
CT: control target
= control target key end

     0   :  { %s606_s12 = smov 0   ;;  %s608_s13 = smov 0   ;;  %s753_s0 = inlined_call_operand.vmem [shape: f32[2,256,36], index: 0, kind: input, shape index: {}]   ;;  %s754_s1 = inlined_call_operand.vmem [shape: f32[36,128], index: 1, kind: input, shape index: {}]   ;;  %s755_s2 = inlined_call_operand.vmem [shape: f32[1,128], index: 2, kind: input, shape index: {}]   ;;  %s756_s3 = inlined_call_operand.vmem [shape: f32[2,256,8], index: 3, kind: output, shape index: {}]  }
   0x1   :  { %s610_s14 = smov 0   ;;  %s612_s15 = smov 0  }
   0x2   :  { %s614_s16 = smov 0  }
   0x3 LB: > { %s22_s17 = sadd.s32 1, %s576_s14  ;;  %s25_s18 = sadd.s32 1, %s580_s15  ;;  %s584_s16 = sphi %s614_s16, %s13_s16   ;;  %s580_s15 = sphi %s612_s15, %s760_s15   ;;  %s576_s14 = sphi %s610_s14, %s759_s14   ;;  %s572_s13 = sphi %s608_s13, %s758_s13   ;;  %s568_s12 = sphi %s606_s12, %s757_s12  }
   0x4   : > { %p23_p0 = scmp.ge.s32.totalorder %s22_s17, 2  ;;  %p464_p1 = scmp.ge.s32.totalorder %s584_s16, 1 }
   0x5   : > { %p158_p2 = scmp.lt.s32.totalorder %s584_s16, 5 }
   0x6   : > { %s762_s17 = smov (%p23_p0, %s22_s17), 0  ;;  %s764_s18 = smov (!%p23_p0, %s25_s18), %s580_s15 }
   0x7   : > { %p159_p3 = pnand %p464_p1, %p158_p2  ;;  %p27_p4 = scmp.ge.s32.totalorder %s764_s18, 2 }
   0x8   : > { %s465_s23 = sshll.u32 (!%p159_p3), %s568_s12, 4  ;;  %p191_p5 = scmp.lt.s32.totalorder (!%p159_p3), %s572_s13, 1 }
   0x9   : > { %s766_s18 = smov (%p27_p4, %s764_s18), 0  ;;  %162 = sbr.rel (%p159_p3) target bundleno = 184 (0xb8), region = 32 }
   0xa   : > { %p193_p6 = scmp.lt.s32.totalorder (!%p159_p3), %s465_s23, 31 }
   0xe   : > { %v230_v0 = vld [vmem:[%s754_s1 + $0x20] sm:$0xf]  ;;  %vm284_vm0 = vcmask 1043456   ;;  %v229_v1 = vld [vmem:[%s754_s1 + $0x18] sm:$0xff]  ;;  %v228_v2 = vld [vmem:[%s754_s1 + $0x10] sm:$0xff]  ;;  %s768_s13 = smov (!%p191_p5, %s572_s13), 1 }
   0xf   : > { %491 = vmatpush.msk.msra.mxu2 %vm284_vm0, %v230_v0  ;;  %492 = vmatpush.msk.msra.mxu3 %vm284_vm0, %v230_v0  ;;  %v227_v3 = vld [vmem:[%s754_s1 + $0x8] sm:$0xff]  ;;  %s770_s23 = smov (!%p193_p6, %s465_s23), 31  ;;  %s466_s28 = sshll.u32 %s768_s13, 5  ;;  %v226_v4 = vld [vmem:[%s754_s1] sm:$0xff]  ;;  %vm235_vm1 = vcmask 293888   ;;  %vm353_vm2 = vcmask 64512  }
  0x10   : > { %471 = vmatpush.msk.msra.mxu0 %vm284_vm0, %v230_v0  ;;  %490 = vmatpush.msk.msra.mxu1 %vm284_vm0, %v230_v0  ;;  %s654_s4 = sadd.s32 %s466_s28, %s770_s23  ;;  %v545_v21 = vld [vmem:[%s755_s2] ss:$0 sm:$0xff] }
  0x11   : > { %494 = vmatpush.msra.mxu2 %v229_v1  ;;  %495 = vmatpush.msra.mxu3 %v229_v1  ;;  %s467_s5 = sshll.u32 %s654_s4, 3 }
  0x12   : > { %300 = vmatpush.msra.mxu0 %v229_v1  ;;  %493 = vmatpush.msra.mxu1 %v229_v1  ;;  %s662_s8 = scalar_lea.vmem %s753_s0, %s467_s5  ;;  %s704_s13 = scalar_lea.vmem %s756_s3, %s467_s5 }
  0x13   : > { %497 = vmatpush.msra.mxu2 %v228_v2  ;;  %498 = vmatpush.msra.mxu3 %v228_v2  ;;  %v218_v5 = vld [vmem:[%s662_s8 + $0x40] sm:$0xff]  ;;  %v219_v9 = vld [vmem:[%s662_s8 + $0x48] sm:$0xff]  ;;  %v220_v13 = vld [vmem:[%s662_s8 + $0x50] sm:$0xff] }
  0x14   : > { %301 = vmatpush.msra.mxu0 %v228_v2  ;;  %496 = vmatpush.msra.mxu1 %v228_v2  ;;  %v222_v6 = vld [vmem:[%s662_s8 + $0x60] sm:$0xff]  ;;  %v223_v10 = vld [vmem:[%s662_s8 + $0x68] sm:$0xff]  ;;  %v224_v14 = vld [vmem:[%s662_s8 + $0x70] sm:$0xff] }
  0x15   : > { %500 = vmatpush.msra.mxu2 %v227_v3  ;;  %501 = vmatpush.msra.mxu3 %v227_v3  ;;  %v210_v7 = vld [vmem:[%s662_s8] sm:$0xff]  ;;  %v211_v11 = vld [vmem:[%s662_s8 + $0x8] sm:$0xff]  ;;  %v212_v15 = vld [vmem:[%s662_s8 + $0x10] sm:$0xff] }
  0x16   : > { %302 = vmatpush.msra.mxu0 %v227_v3  ;;  %499 = vmatpush.msra.mxu1 %v227_v3  ;;  %v214_v8 = vld [vmem:[%s662_s8 + $0x20] sm:$0xff]  ;;  %v215_v12 = vld [vmem:[%s662_s8 + $0x28] sm:$0xff]  ;;  %v216_v16 = vld [vmem:[%s662_s8 + $0x30] sm:$0xff] }
  0x17   : > { %503 = vmatpush.msra.mxu2 %v226_v4  ;;  %504 = vmatpush.msra.mxu3 %v226_v4  ;;  %v221_v17 = vld [vmem:[%s662_s8 + $0x58] sm:$0xff] }
  0x18   : > { %480 = vmatmul.msk.f32.vlgmr.msra.gmra.mxu2 %vm235_vm1, %v218_v5  ;;  %484 = vmatmul.msk.f32.vlgmr.msra.gmra.mxu3 %vm235_vm1, %v222_v6  ;;  %v225_v18 = vld [vmem:[%s662_s8 + $0x78] sm:$0xff] }
  0x19   : > { %303 = vmatpush.msra.mxu0 %v226_v4  ;;  %502 = vmatpush.msra.mxu1 %v226_v4  ;;  %v213_v19 = vld [vmem:[%s662_s8 + $0x18] sm:$0xff] }
  0x1a   : > { %472 = vmatmul.msk.f32.vlgmr.msra.gmra.mxu0 %vm235_vm1, %v210_v7  ;;  %476 = vmatmul.msk.f32.vlgmr.msra.gmra.mxu1 %vm235_vm1, %v214_v8  ;;  %v217_v20 = vld [vmem:[%s662_s8 + $0x38] sm:$0xff] }
  0x20   : > { %481 = vmatmul.msk.f32.gmra.mxu2 %vm235_vm1, %v219_v9  ;;  %485 = vmatmul.msk.f32.gmra.mxu3 %vm235_vm1, %v223_v10 }
  0x22   : > { %473 = vmatmul.msk.f32.gmra.mxu0 %vm235_vm1, %v211_v11  ;;  %477 = vmatmul.msk.f32.gmra.mxu1 %vm235_vm1, %v215_v12 }
  0x28   : > { %482 = vmatmul.msk.f32.gmra.mxu2 %vm235_vm1, %v220_v13  ;;  %486 = vmatmul.msk.f32.gmra.mxu3 %vm235_vm1, %v224_v14 }
  0x2a   : > { %474 = vmatmul.msk.f32.gmra.mxu0 %vm235_vm1, %v212_v15  ;;  %478 = vmatmul.msk.f32.gmra.mxu1 %vm235_vm1, %v216_v16 }
  0x30   : > { %483 = vmatmul.msk.f32.gmra.mxu2 %vm235_vm1, %v221_v17  ;;  %487 = vmatmul.msk.f32.gmra.mxu3 %vm235_vm1, %v225_v18 }
  0x32   : > { %475 = vmatmul.msk.f32.gmra.mxu0 %vm235_vm1, %v213_v19  ;;  %479 = vmatmul.msk.f32.gmra.mxu1 %vm235_vm1, %v217_v20 }
  0x97   : > { %v305_v22 = vpop.f32.mrf.mxu0  ;;  %v317_v23 = vpop.f32.mrf.mxu1 }
  0x98   : > { %v306_v24 = vadd.f32 %v545_v21, %v305_v22  ;;  %v318_v25 = vadd.f32 %v545_v21, %v317_v23 }
  0x9a   : > { %354 = vst.msk [vmem:[%s704_s13] sm:$0xff] %vm353_vm2, %v306_v24 }
  0x9b   : > { %358 = vst.msk [vmem:[%s704_s13 + $0x20] sm:$0xff] %vm353_vm2, %v318_v25  ;;  %v329_v26 = vpop.f32.mrf.mxu2  ;;  %v341_v27 = vpop.f32.mrf.mxu3 }
  0x9c   : > { %v330_v28 = vadd.f32 %v545_v21, %v329_v26  ;;  %v342_v29 = vadd.f32 %v545_v21, %v341_v27 }
  0x9e   : > { %362 = vst.msk [vmem:[%s704_s13 + $0x40] sm:$0xff] %vm353_vm2, %v330_v28 }
  0x9f   : > { %366 = vst.msk [vmem:[%s704_s13 + $0x60] sm:$0xff] %vm353_vm2, %v342_v29  ;;  %v308_v30 = vpop.f32.mrf.mxu0  ;;  %v320_v31 = vpop.f32.mrf.mxu1 }
  0xa0   : > { %v309_v32 = vadd.f32 %v545_v21, %v308_v30  ;;  %v321_v33 = vadd.f32 %v545_v21, %v320_v31 }
  0xa2   : > { %355 = vst.msk [vmem:[%s704_s13 + $0x8] sm:$0xff] %vm353_vm2, %v309_v32 }
  0xa3   : > { %359 = vst.msk [vmem:[%s704_s13 + $0x28] sm:$0xff] %vm353_vm2, %v321_v33  ;;  %v332_v34 = vpop.f32.mrf.mxu2  ;;  %v344_v35 = vpop.f32.mrf.mxu3 }
  0xa4   : > { %v333_v36 = vadd.f32 %v545_v21, %v332_v34  ;;  %v345_v37 = vadd.f32 %v545_v21, %v344_v35 }
  0xa6   : > { %363 = vst.msk [vmem:[%s704_s13 + $0x48] sm:$0xff] %vm353_vm2, %v333_v36 }
  0xa7   : > { %367 = vst.msk [vmem:[%s704_s13 + $0x68] sm:$0xff] %vm353_vm2, %v345_v37  ;;  %v311_v38 = vpop.f32.mrf.mxu0  ;;  %v323_v39 = vpop.f32.mrf.mxu1 }
  0xa8   : > { %v312_v40 = vadd.f32 %v545_v21, %v311_v38  ;;  %v324_v41 = vadd.f32 %v545_v21, %v323_v39 }
  0xaa   : > { %356 = vst.msk [vmem:[%s704_s13 + $0x10] sm:$0xff] %vm353_vm2, %v312_v40 }
  0xab   : > { %360 = vst.msk [vmem:[%s704_s13 + $0x30] sm:$0xff] %vm353_vm2, %v324_v41  ;;  %v335_v42 = vpop.f32.mrf.mxu2  ;;  %v347_v43 = vpop.f32.mrf.mxu3 }
  0xac   : > { %v336_v44 = vadd.f32 %v545_v21, %v335_v42  ;;  %v348_v45 = vadd.f32 %v545_v21, %v347_v43 }
  0xae   : > { %364 = vst.msk [vmem:[%s704_s13 + $0x50] sm:$0xff] %vm353_vm2, %v336_v44 }
  0xaf   : > { %368 = vst.msk [vmem:[%s704_s13 + $0x70] sm:$0xff] %vm353_vm2, %v348_v45  ;;  %v314_v46 = vpop.f32.mrf.mxu0  ;;  %v326_v47 = vpop.f32.mrf.mxu1 }
  0xb0   : > { %v315_v48 = vadd.f32 %v545_v21, %v314_v46  ;;  %v327_v49 = vadd.f32 %v545_v21, %v326_v47 }
  0xb2   : > { %357 = vst.msk [vmem:[%s704_s13 + $0x18] sm:$0xff] %vm353_vm2, %v315_v48 }
  0xb3   : > { %361 = vst.msk [vmem:[%s704_s13 + $0x38] sm:$0xff] %vm353_vm2, %v327_v49  ;;  %v338_v50 = vpop.f32.mrf.mxu2  ;;  %v350_v51 = vpop.f32.mrf.mxu3 }
  0xb4   : > { %v339_v52 = vadd.f32 %v545_v21, %v338_v50  ;;  %v351_v53 = vadd.f32 %v545_v21, %v350_v51 }
  0xb6   : > { %365 = vst.msk [vmem:[%s704_s13 + $0x58] sm:$0xff] %vm353_vm2, %v339_v52 }
  0xb7   : > { %369 = vst.msk [vmem:[%s704_s13 + $0x78] sm:$0xff] %vm353_vm2, %v351_v53 }
  0xb8 PF: > { %s13_s16 = sadd.s32 1, %s584_s16   ;;  %s757_s12 = smov %s576_s14 }
  0xb9   : > { %p10_p7 = scmp.ge.s32.totalorder %s13_s16, 6   ;;  %s758_s13 = smov %s580_s15 }
  0xba   : > { %s759_s14 = smov %s762_s17  ;;  %s760_s15 = smov %s766_s18 }
  0xbb   :  { %12 = sbr.rel (!%p10_p7) target bundleno = 3 (0x3), region = 62 }

</bundles_post_ra>
